<compile_context>
chip_gen: v6e
topology: v6e:2x2x1
jax: 0.10.0
libtpu: 0.0.40
codegen_flags: <defaults>
</compile_context>

<pallas_src>
import math

import jax
import jax.numpy as jnp
from jax.experimental import pallas as pl
from jax.experimental.pallas import tpu as pltpu

LN_EPS = 1e-5


def _patch_embed_kernel(p_ref, w_ref, b_ref, gamma_ref, beta_ref, out_ref):
    # p_ref: (tile, K) bf16   w_ref: (K, E) bf16   b/gamma/beta: (1, E) f32   out: (tile, E) f32
    # Patch projection (== Conv2d with kernel=stride=patch) on the MXU, f32 accumulation.
    y = jnp.dot(p_ref[...], w_ref[...], preferred_element_type=jnp.float32)  # (tile, E)
    y = y + b_ref[...]

    # LayerNorm over embed_dim (eps=1e-5, elementwise affine), all f32.
    mean = jnp.mean(y, axis=-1, keepdims=True)
    c = y - mean
    var = jnp.mean(c * c, axis=-1, keepdims=True)
    yn = c * jax.lax.rsqrt(var + LN_EPS)
    out_ref[...] = (yn * gamma_ref[...] + beta_ref[...]).astype(out_ref.dtype)


def _extract_patches(x, patch_size):
    """(B, C, H, W) -> (B*N, C*P*P).  Patch order = row-major over (H/P, W/P);
    feature order = (c, dy, dx) to match Conv2d weight.reshape(E, -1)."""
    B, C, H, W = x.shape
    P = patch_size
    Hp, Wp = H // P, W // P
    x = x.reshape(B, C, Hp, P, Wp, P)
    x = x.transpose(0, 2, 4, 1, 3, 5)            # (B, Hp, Wp, C, P, P)
    return x.reshape(B * Hp * Wp, C * P * P)


def _round_up(x, m):
    return ((x + m - 1) // m) * m


def _pick_row_tile(m, max_tile=512):
    """Largest multiple-of-8 divisor of m up to max_tile; else a padded multiple-of-8 tile."""
    best = None
    t = 8
    while t <= min(m, max_tile):
        if m % t == 0:
            best = t
        t += 8
    if best is not None:
        return best
    return min(max_tile, _round_up(m, 8))


def patch_embedding(x, params, patch_size, *, row_tile=None):
    """x: (B, C, H, W) f32. Returns (B, N, E) f32 with N = (H/P)*(W/P)."""
    B, C, H, W = x.shape
    assert H % patch_size == 0 and W % patch_size == 0
    E = params["proj_weight"].shape[0]
    K = C * patch_size * patch_size
    N = (H // patch_size) * (W // patch_size)
    M = B * N

    if row_tile is None:
        row_tile = _pick_row_tile(M)
    Mp = _round_up(M, row_tile)
    n_tiles = Mp // row_tile

    # Host-side prep (layout plumbing, free relative to the kernel): patchify, bf16 cast for
    # MXU inputs, weight pre-transposed with contraction dim last.
    patches = _extract_patches(x, patch_size).astype(jnp.bfloat16)            # (M, K)
    if Mp != M:
        patches = jnp.pad(patches, ((0, Mp - M), (0, 0)))
    w_t = params["proj_weight"].reshape(E, K).T.astype(jnp.bfloat16)          # (K, E)
    b = params["proj_bias"].reshape(1, E).astype(jnp.float32)
    gamma = params["ln_gamma"].reshape(1, E).astype(jnp.float32)
    beta = params["ln_beta"].reshape(1, E).astype(jnp.float32)

    p_spec = pl.BlockSpec((row_tile, K), lambda i: (i, 0))
    w_spec = pl.BlockSpec((K, E), lambda i: (0, 0))
    vec_spec = pl.BlockSpec((1, E), lambda i: (0, 0))
    out_spec = pl.BlockSpec((row_tile, E), lambda i: (i, 0))

    out_flat = pl.pallas_call(
        _patch_embed_kernel,
        out_shape=jax.ShapeDtypeStruct((Mp, E), jnp.float32),
        grid_spec=pltpu.PrefetchScalarGridSpec(
            num_scalar_prefetch=0,
            grid=(n_tiles,),
            in_specs=[p_spec, w_spec, vec_spec, vec_spec, vec_spec],
            out_specs=out_spec,
        ),
        compiler_params=pltpu.CompilerParams(
            dimension_semantics=("parallel",),
        ),
    )(patches, w_t, b, gamma, beta)

    return out_flat[:M].reshape(B, N, E)


def _reference(x, params, patch_size):
    """Pure-JAX f32 reference of the PyTorch module (conv == patchify @ W^T + b, then LN)."""
    B, C, H, W = x.shape
    E = params["proj_weight"].shape[0]
    K = C * patch_size * patch_size
    N = (H // patch_size) * (W // patch_size)
    p = _extract_patches(x, patch_size).astype(jnp.float32)                   # (M, K)
    y = p @ params["proj_weight"].reshape(E, K).T + params["proj_bias"][None, :]
    mean = jnp.mean(y, axis=-1, keepdims=True)
    var = jnp.mean((y - mean) ** 2, axis=-1, keepdims=True)
    yn = (y - mean) * jax.lax.rsqrt(var + LN_EPS)
    yn = yn * params["ln_gamma"][None, :] + params["ln_beta"][None, :]
    return yn.reshape(B, N, E)


def init_params(key, in_channels, patch_size, embed_dim):
    """Shapes match PatchEmbedding.__init__ (Conv2d + LayerNorm)."""
    k1, k2 = jax.random.split(key)
    fan_in = in_channels * patch_size * patch_size
    bound = 1.0 / math.sqrt(fan_in)
    return {
        "proj_weight": jax.random.uniform(
            k1, (embed_dim, in_channels, patch_size, patch_size),
            jnp.float32, -bound, bound),
        "proj_bias": jax.random.uniform(k2, (embed_dim,), jnp.float32, -bound, bound),
        "ln_gamma": jnp.ones((embed_dim,), jnp.float32),
        "ln_beta": jnp.zeros((embed_dim,), jnp.float32),
    }


if __name__ == "__main__":
    # Small, module-consistent shapes: batch=2, channels=4, spatial=16x16, patch=4.
    # embed_dim=128 keeps the output lane-dense (multiple of 128).
    B, C, H, W = 2, 4, 16, 16
    PATCH, EMBED = 4, 128

    key = jax.random.PRNGKey(0)
    kx, kp = jax.random.split(key)
    x = jax.random.normal(kx, (B, C, H, W), jnp.float32)
    params = init_params(kp, C, PATCH, EMBED)

    # row_tile=8 exercises multiple grid steps even at toy sizes (M = B*N = 32 -> 4 steps).
    out = patch_embedding(x, params, PATCH, row_tile=8)
    jax.block_until_ready(out)

    N = (H // PATCH) * (W // PATCH)
    assert out.shape == (B, N, EMBED) and out.dtype == jnp.float32
    assert bool(jnp.all(jnp.isfinite(out)))

    # Correctness vs. f32 reference (kernel matmul runs in bf16 -> loose tolerance).
    ref = _reference(x, params, PATCH)
    assert bool(jnp.max(jnp.abs(out - ref)) < 3e-2), float(jnp.max(jnp.abs(out - ref)))

    print("KERNEL_OK")
</pallas_src>

<mosaic_0001>
module attributes {stable_mosaic.version = 11 : i64} {
  func.func @_patch_embed_kernel(%arg0: i32, %arg1: memref<8x64xbf16, #tpu.memory_space<vmem>>, %arg2: memref<64x128xbf16, #tpu.memory_space<vmem>>, %arg3: memref<1x128xf32, #tpu.memory_space<vmem>>, %arg4: memref<1x128xf32, #tpu.memory_space<vmem>>, %arg5: memref<1x128xf32, #tpu.memory_space<vmem>>, %arg6: memref<8x128xf32, #tpu.memory_space<vmem>>) attributes {dimension_semantics = [#tpu.dimension_semantics<parallel>], iteration_bounds = array<i64: 4>, scalar_prefetch = 0 : i64, scratch_operands = 0 : i64, tpu.core_type = #tpu.core_type<tc>, window_params = [{transform_indices = @transform_0, window_bounds = array<i64: 8, 64>}, {pipeline_mode = #tpu.pipeline_mode<synchronous>, transform_indices = @transform_1, window_bounds = array<i64: 64, 128>}, {pipeline_mode = #tpu.pipeline_mode<synchronous>, transform_indices = @transform_2, window_bounds = array<i64: 1, 128>}, {pipeline_mode = #tpu.pipeline_mode<synchronous>, transform_indices = @transform_3, window_bounds = array<i64: 1, 128>}, {pipeline_mode = #tpu.pipeline_mode<synchronous>, transform_indices = @transform_4, window_bounds = array<i64: 1, 128>}, {transform_indices = @transform_5, window_bounds = array<i64: 8, 128>}]} {
    %c0 = arith.constant 0 : index
    %c0_0 = arith.constant 0 : index
    %0 = vector.load %arg1[%c0, %c0_0] : memref<8x64xbf16, #tpu.memory_space<vmem>>, vector<8x64xbf16>
    %c0_1 = arith.constant 0 : index
    %c0_2 = arith.constant 0 : index
    %1 = vector.load %arg2[%c0_1, %c0_2] : memref<64x128xbf16, #tpu.memory_space<vmem>>, vector<64x128xbf16>
    %cst = arith.constant dense<0.000000e+00> : vector<8x128xf32>
    %2 = tpu.matmul %0, %1, %cst {dimension_numbers = #tpu.dot_dimension_numbers<[1], [0], [0], [1], [0, 0, 1, 1], [], []>} : vector<8x64xbf16>, vector<64x128xbf16>, vector<8x128xf32> -> vector<8x128xf32>
    %c0_3 = arith.constant 0 : index
    %c0_4 = arith.constant 0 : index
    %3 = vector.load %arg3[%c0_3, %c0_4] : memref<1x128xf32, #tpu.memory_space<vmem>>, vector<1x128xf32>
    %4 = vector.broadcast %3 : vector<1x128xf32> to vector<8x128xf32>
    %5 = arith.addf %2, %4 : vector<8x128xf32>
    %cst_5 = arith.constant dense<0.000000e+00> : vector<8xf32>
    %6 = vector.multi_reduction <add>, %5, %cst_5 [1] : vector<8x128xf32> to vector<8xf32>
    %7 = vector.shape_cast %6 : vector<8xf32> to vector<8x1xf32>
    %cst_6 = arith.constant 1.280000e+02 : f32
    %8 = vector.broadcast %cst_6 : f32 to vector<8x1xf32>
    %9 = arith.divf %7, %8 : vector<8x1xf32>
    %10 = vector.broadcast %9 : vector<8x1xf32> to vector<8x128xf32>
    %11 = arith.subf %5, %10 : vector<8x128xf32>
    %12 = arith.mulf %11, %11 : vector<8x128xf32>
    %cst_7 = arith.constant dense<0.000000e+00> : vector<8xf32>
    %13 = vector.multi_reduction <add>, %12, %cst_7 [1] : vector<8x128xf32> to vector<8xf32>
    %14 = vector.shape_cast %13 : vector<8xf32> to vector<8x1xf32>
    %cst_8 = arith.constant 1.280000e+02 : f32
    %15 = vector.broadcast %cst_8 : f32 to vector<8x1xf32>
    %16 = arith.divf %14, %15 : vector<8x1xf32>
    %cst_9 = arith.constant 9.99999974E-6 : f32
    %17 = vector.broadcast %cst_9 : f32 to vector<8x1xf32>
    %18 = arith.addf %16, %17 : vector<8x1xf32>
    %19 = math.rsqrt %18 : vector<8x1xf32>
    %20 = vector.broadcast %19 : vector<8x1xf32> to vector<8x128xf32>
    %21 = arith.mulf %11, %20 : vector<8x128xf32>
    %c0_10 = arith.constant 0 : index
    %c0_11 = arith.constant 0 : index
    %22 = vector.load %arg4[%c0_10, %c0_11] : memref<1x128xf32, #tpu.memory_space<vmem>>, vector<1x128xf32>
    %23 = vector.broadcast %22 : vector<1x128xf32> to vector<8x128xf32>
    %24 = arith.mulf %21, %23 : vector<8x128xf32>
    %c0_12 = arith.constant 0 : index
    %c0_13 = arith.constant 0 : index
    %25 = vector.load %arg5[%c0_12, %c0_13] : memref<1x128xf32, #tpu.memory_space<vmem>>, vector<1x128xf32>
    %26 = vector.broadcast %25 : vector<1x128xf32> to vector<8x128xf32>
    %27 = arith.addf %24, %26 : vector<8x128xf32>
    %c0_14 = arith.constant 0 : index
    %c0_15 = arith.constant 0 : index
    %28 = vector.load %arg6[%c0_14, %c0_15] : memref<8x128xf32, #tpu.memory_space<vmem>>, vector<8x128xf32>
    tpu.vector_store %arg6[%c0_14, %c0_15], %27 {strides = array<i32>} : memref<8x128xf32, #tpu.memory_space<vmem>>, vector<8x128xf32>,
    return
  }
  func.func @transform_0(%arg0: i32) -> (i32, i32) {
    %c0_i32 = arith.constant 0 : i32
    %c0_i32_0 = arith.constant 0 : i32
    return %arg0, %c0_i32 : i32, i32
  }
  func.func @transform_1(%arg0: i32) -> (i32, i32) {
    %c0_i32 = arith.constant 0 : i32
    %c0_i32_0 = arith.constant 0 : i32
    %c0_i32_1 = arith.constant 0 : i32
    return %c0_i32, %c0_i32_0 : i32, i32
  }
  func.func @transform_2(%arg0: i32) -> (i32, i32) {
    %c0_i32 = arith.constant 0 : i32
    %c0_i32_0 = arith.constant 0 : i32
    %c0_i32_1 = arith.constant 0 : i32
    return %c0_i32, %c0_i32_0 : i32, i32
  }
  func.func @transform_3(%arg0: i32) -> (i32, i32) {
    %c0_i32 = arith.constant 0 : i32
    %c0_i32_0 = arith.constant 0 : i32
    %c0_i32_1 = arith.constant 0 : i32
    return %c0_i32, %c0_i32_0 : i32, i32
  }
  func.func @transform_4(%arg0: i32) -> (i32, i32) {
    %c0_i32 = arith.constant 0 : i32
    %c0_i32_0 = arith.constant 0 : i32
    %c0_i32_1 = arith.constant 0 : i32
    return %c0_i32, %c0_i32_0 : i32, i32
  }
  func.func @transform_5(%arg0: i32) -> (i32, i32) {
    %c0_i32 = arith.constant 0 : i32
    %c0_i32_0 = arith.constant 0 : i32
    return %arg0, %c0_i32 : i32, i32
  }
}

</mosaic_0001>

<bundles_post_ra>
// kernel: tpu_custom_call.1
= control target key start
LH: loop header
LB: loop body
LE: loop exit
PB: predicated region body
PF: predicated region fallthrough
CT: control target
= control target key end

     0   :  { %10 = vsyncpa [#allocation3], 0  ;;  %s892_s0 = inlined_call_operand.hbm [shape: bf16[32,64], index: 0, kind: input, shape index: {}]   ;;  %s893_s1 = inlined_call_operand.hbm [shape: bf16[64,128], index: 1, kind: input, shape index: {}]   ;;  %s894_s2 = inlined_call_operand.vmem [shape: f32[1,128], index: 2, kind: input, shape index: {}]   ;;  %s895_s3 = inlined_call_operand.vmem [shape: f32[1,128], index: 3, kind: input, shape index: {}]   ;;  %s896_s4 = inlined_call_operand.vmem [shape: f32[1,128], index: 4, kind: input, shape index: {}]   ;;  %s897_s5 = inlined_call_operand.hbm [shape: f32[32,128], index: 5, kind: output, shape index: {}]  }
   0x1   :  { %12 = vsyncpa [#allocation3 + $0x1], 0 }
   0x2   :  { %13 = vsyncpa [#allocation6], 0 }
   0x3   :  { %14 = vsyncpa [#allocation4], 0 }
   0x4   :  { %16 = vsyncpa [#allocation4 + $0x1], 0  ;;  %s730_s18 = smov 0   ;;  %s732_s19 = smov 0  }
   0x5   :  { %s734_s20 = smov 0   ;;  %s736_s21 = smov 0  }
   0x6 LB: > { %s751_s22 = sadd.s32 4294967295, %s691_s21   ;;  %s463_s23 = sadd.s32 4294967294, %s691_s21   ;;  %s691_s21 = sphi %s736_s21, %s918_s21   ;;  %s687_s20 = sphi %s734_s20, %s917_s20   ;;  %s683_s19 = sphi %s732_s19, %s916_s19   ;;  %s679_s18 = sphi %s730_s18, %s915_s18  }
   0x7   : > { %p42_p0 = scmp.ne.s32.totalorder %s683_s19, %s679_s18  ;;  %p898_p1 = scmp.eq.s32.totalorder %s751_s22, 0 }
   0x8   : > { %p156_p3 = scmp.eq.s32.totalorder %s463_s23, 3  ;;  %p464_p5 = scmp.ge.s32.totalorder %s691_s21, 1 }
   0x9   : > { %p760_p4 = por %p898_p1, %p42_p0  ;;  %p163_p7 = scmp.lt.s32.totalorder %s691_s21, 5 }
   0xa   : > { %p765_p6 = por %p156_p3, %p42_p0  ;;  %s693_s27 = smov [#allocation5]  }
   0xb   : > { %s902_s24 = scalar_select %p760_p4, 1, 0 }
   0xc   : > { %s903_s25 = scalar_select %p765_p6, 1, 0 }
   0xd   : > { %p770_p8 = pnand %p464_p5, %p163_p7  ;;  %s175_s28 = sshll.u32 %s693_s27, 4  ;;  %s176_s28 = int_to_ptr.vmem [resolvable:$true] %s175_s28 }
   0xe   : > { %s783_s30 = sadd.s32 1, %s691_s21   ;;  %s29_s6 = sadd.s32 1, %s687_s20 }
   0xf   : > { %s904_s26 = scalar_select %p770_p8, 1, 0 }
  0x10   : > { %p510_p9 = pneg %p770_p8  ;;  %s26_s7 = ssub.s32 %s691_s21, %s783_s30 }
  0x11   : > { %s580_s8 = scalar_lea.vmem %s176_s28, 512  ;;  %p588_p3 = scmp.lt.s32.totalorder %s176_s28, %s176_s28 }
  0x12   : > { %p778_p10 = pnand %p510_p9, %p898_p1  ;;  %p581_p12 = scmp.ne.s32.totalorder %s176_s28, %s580_s8 }
  0x13   : > { %p589_p5 = scmp.lt.s32.totalorder %s580_s8, %s580_s8 }
  0x14   : > { %p571_p11 = pneg %p778_p10 }
  0x15   : > { %p590_p7 = por %p589_p5, %p588_p3 }
  0x16   : > { %p583_p13 = pnand %p581_p12, %p571_p11 }
  0x18   : > { %p584_p0 = pneg %p583_p13 }
  0x1a   : > { %p591_p2 = pnand %p590_p7, %p584_p0 }
  0x1c   : > { %594 = shalt.err (!%p591_p2)
}
  0x1d   : > { %s694_s9 = smov 64   ;;  %s695_s10 = smov 4  }
  0x1e   : > { %513 = dma.hbm_to_vmem [thread:$0]  (!%p778_p10), %s893_s1, 512, %s176_s28, [#allocation6], %s694_s9, %s694_s9, %s695_s10  }
  0x1f   : > { %p27_p9 = scmp.eq.s32.totalorder %s26_s7, 0  ;;  %p36_p11 = scmp.ne.s32.totalorder %s687_s20, %s683_s19 }
  0x20   : > { %p37_p12 = scmp.eq.s32.totalorder %s691_s21, 0  ;;  %p523_p2 = scmp.lt.s32.totalorder %s691_s21, 4 }
  0x21   : > { %s800_s13 = scalar_select %p27_p9, %s687_s20, %s29_s6  }
  0x22   : > { %p38_p13 = por %p37_p12, %p36_p11  ;;  %p906_p0 = scmp.eq.s32.totalorder %s751_s22, 3 }
  0x23   : > { %s198_s15 = sand.u32 1, %s687_s20   ;;  %s468_s16 = sshll.u32 %s691_s21, 6 }
  0x24   : > { %p804_p3 = por %p906_p0, %p36_p11  ;;  %s467_s17 = sshll.u32 %s198_s15, 2 }
  0x25   : > { %s813_s29 = scalar_lea.hbm %s892_s0, %s468_s16  ;;  %s202_s28 = scalar_lea.vmem [#allocation2], %s467_s17 }
  0x26   : > { %s907_s14 = scalar_select %p804_p3, 1, 0 }
  0x27   : > { %s209_s6 = sshll.u32 %s202_s28, 4  ;;  %p815_p10 = pnand %p523_p2, %p38_p13  ;;  %s210_s6 = int_to_ptr.vmem [resolvable:$true] %s209_s6 }
  0x28   : > { %s199_s8 = scalar_lea.sflag [#allocation3], %s198_s15  ;;  %s595_s9 = scalar_lea.hbm %s813_s29, 64 }
  0x29   : > { %p596_p5 = scmp.ne.s32.totalorder %s813_s29, %s595_s9  ;;  %p597_p7 = pneg %p815_p10 }
  0x2a   : > { %s600_s12 = scalar_lea.hbm %s892_s0, 256  ;;  %p601_p12 = scmp.lt.s32.totalorder %s813_s29, %s892_s0 }
  0x2b   : > { %p598_p9 = pnand %p597_p7, %p596_p5  ;;  %p602_p2 = scmp.lt.s32.totalorder %s600_s12, %s595_s9 }
  0x2d   : > { %p599_p11 = pneg %p598_p9  ;;  %p603_p13 = por %p602_p2, %p601_p12 }
  0x2f   : > { %p604_p0 = pnand %p603_p13, %p599_p11 }
  0x31   : > { %607 = shalt.err (!%p604_p0)
}
  0x32   : > { %s608_s23 = scalar_lea.vmem %s210_s6, 64  ;;  %s696_s15 = smov [#allocation2]  }
  0x33   : > { %p609_p1 = scmp.ne.s32.totalorder %s210_s6, %s608_s23  ;;  %s613_s27 = sshll.u32 %s696_s15, 4  ;;  %s614_s27 = int_to_ptr.vmem [resolvable:$false] %s613_s27 }
  0x34   : > { %s615_s28 = scalar_lea.vmem %s614_s27, 128  ;;  %p616_p5 = scmp.lt.s32.totalorder %s210_s6, %s614_s27 }
  0x35   : > { %p611_p6 = pnand %p609_p1, %p597_p7  ;;  %p617_p9 = scmp.lt.s32.totalorder %s615_s28, %s608_s23 }
  0x37   : > { %p612_p3 = pneg %p611_p6  ;;  %p618_p4 = por %p617_p9, %p616_p5 }
  0x39   : > { %p619_p8 = pnand %p618_p4, %p612_p3 }
  0x3b   : > { %622 = shalt.err (!%p619_p8)
}
  0x3c   : > { %517 = dma.hbm_to_vmem [thread:$0]  (!%p815_p10), %s813_s29, 64, %s210_s6, %s199_s8  }
  0x3d   : > { %p909_p11 = scmp.ne.s32.totalorder %s904_s26, 0 }
  0x3e   : > { %s836_s9 = sand.u32 (!%p909_p11), 1, %s683_s19   ;;  %p910_p1 = scmp.ne.s32.totalorder (!%p909_p11), %s902_s24, 0 }
  0x3f   : > { %218 = sbr.rel (%p909_p11) target bundleno = 603 (0x25b), region = 40  ;;  %s470_s10 = sshll.u32 (!%p909_p11), %s836_s9, 2 }
  0x40   : > { %s221_s11 = scalar_lea.sflag (!%p909_p11), [#allocation3], %s836_s9  ;;  %s224_s12 = scalar_lea.vmem (!%p909_p11), [#allocation2], %s470_s10 }
  0x44   : > { %666 = dma.done.wait (%p910_p1), %s221_s11, 64  }
  0x45   : > { %668 = vsyncadd (%p910_p1), %s221_s11, 4294967232  ;;  %p911_p4 = scmp.eq.s32.totalorder %s751_s22, 0 }
  0x47   : > { %670 = dma.done.wait (%p911_p4), [#allocation6], 512   ;;  %p912_p6 = pmov %p911_p4 }
  0x48   : > { %v697_v0 = vmov 0.0   ;;  %vm698_vm0 = vmmov 0   ;;  %v563_v1 = vld [vmem:[#allocation5 + $0x18] sm:$0xff]   ;;  %v564_v2 = vld [vmem:[#allocation5 + $0x10] sm:$0xff]   ;;  %v565_v3 = vld [vmem:[#allocation5 + $0x8] sm:$0xff]   ;;  %vm296_vm1 = vcmask 523264  }
  0x49   : > { %672 = vsyncadd (%p912_p6), [#allocation6], 4294966784  ;;  %490 = vmatprep.subr.bf16.mxu0 %v697_v0  ;;  %498 = vmatprep.mubr.msk.bf16.mxu0 %vm698_vm0, %v697_v0  ;;  %v566_v4 = vld [vmem:[#allocation5] sm:$0xff]   ;;  %v256_v5 = vld [vmem:[%s224_s12] sm:$0xf]  ;;  %s472_s29 = sshll.u32 %s836_s9, 3 }
  0x4a   : > { %491 = vmatpush3.bf16.msra.mxu0 %v563_v1  ;;  %v473_v6 = vld [vmem:[%s894_s2] ss:$0 sm:$0xff]  ;;  %s482_s17 = sshll.u32 %s751_s22, 7  ;;  %s254_s23 = scalar_lea.vmem [#allocation7], %s472_s29 }
  0x4b   : > { %492 = vmatprep.subr.bf16.mxu0 %v697_v0  ;;  %v479_v20 = vld [vmem:[%s895_s3] ss:$0 sm:$0xff]  ;;  %s383_s15 = sshll.u32 %s254_s23, 4  ;;  %s381_s10 = scalar_lea.hbm %s897_s5, %s482_s17  ;;  %s384_s15 = int_to_ptr.vmem [resolvable:$true] %s383_s15 }
  0x4c   : > { %v480_v22 = vld [vmem:[%s896_s4] ss:$0 sm:$0xff]  ;;  %s370_s11 = scalar_lea.sflag [#allocation4], %s836_s9  ;;  %s623_s12 = scalar_lea.vmem %s384_s15, 128 }
  0x4d   : > { %p624_p8 = scmp.ne.s32.totalorder %s384_s15, %s623_s12  ;;  %p913_p3 = scmp.ne.s32.totalorder %s907_s14, 0 }
  0x4e   : > { %493 = vmatpush3.bf16.msra.mxu0 %v564_v2  ;;  %s699_s24 = smov [#allocation7]  }
  0x4f   : > { %494 = vmatprep.subr.bf16.mxu0 %v697_v0  ;;  %p625_p10 = pnand %p624_p8, %p913_p3  ;;  %s627_s26 = sshll.u32 %s699_s24, 4  ;;  %s628_s26 = int_to_ptr.vmem [resolvable:$false] %s627_s26 }
  0x50   : > { %s629_s22 = scalar_lea.vmem %s628_s26, 256  ;;  %p630_p12 = scmp.lt.s32.totalorder %s384_s15, %s628_s26 }
  0x51   : > { %p626_p7 = pneg %p625_p10  ;;  %p631_p2 = scmp.lt.s32.totalorder %s629_s22, %s623_s12 }
  0x52   : > { %495 = vmatpush3.bf16.msra.mxu0 %v565_v3 }
  0x53   : > { %496 = vmatprep.subr.bf16.mxu0 %v697_v0  ;;  %p632_p13 = por %p631_p2, %p630_p12 }
  0x55   : > { %p633_p0 = pnand %p632_p13, %p626_p7 }
  0x56   : > { %497 = vmatpush3.bf16.msra.mxu0 %v566_v4 }
  0x59   : > { %499 = vmatmul.mubr.msk.bf16.vlgmr.msra.gmra.mxu0 %vm296_vm1, %v256_v5 }
 0x119   : > { %v334_v7 = vpop.f32.mrf.mxu0 }
 0x11a   : > { %v335_v8 = vadd.f32 %v473_v6, %v334_v7 }
 0x11b   : > { %v500_v9 = vpop.f32.mrf.mxu0 }
 0x11c   : > { %340 = vadd.xlane.f32.xlu0 %v335_v8 }
 0x11d   : > { %v337_v10 = vpop.f32.mrf.mxu0 }
 0x11f   : > { %v501_v11 = vpop.f32.mrf.mxu0 }
 0x1a5   : > { %v341_v12 = vpop.xlane.xlu0 %340 }
 0x1a6   : > { %v343_v13 = vmul.f32 0.0078125, %v341_v12 }
 0x1a8   : > { %v344_v14 = vsub.f32 %v335_v8, %v343_v13 }
 0x1aa   : > { %v345_v15 = vmul.f32 %v344_v14, %v344_v14 }
 0x1ac   : > { %346 = vadd.xlane.f32.xlu0 %v345_v15 }
 0x235   : > { %v347_v16 = vpop.xlane.xlu0 %346 }
 0x236   : > { %v348_v17 = vmul.f32 0.0078125, %v347_v16 }
 0x238   : > { %v349_v18 = vadd.f32 1e-05, %v348_v17 }
 0x23a   : > { %567 = vrsqrt.f32 %v349_v18 }
 0x247   : > { %v568_v19 = vpop.eup %567 }
 0x248   : > { %v351_v21 = vmul.f32 %v568_v19, %v344_v14 }
 0x24a   : > { %v359_v23 = vmul.f32 %v479_v20, %v351_v21 }
 0x24c   : > { %v367_v24 = vadd.f32 %v480_v22, %v359_v23 }
 0x24e   : > { %368 = vst [vmem:[%s254_s23] sm:$0xff] %v367_v24 }
 0x24f   : > { %636 = shalt.err (!%p633_p0)
}
 0x250   : > { %s637_s29 = scalar_lea.hbm %s381_s10, 128  ;;  %s641_s7 = scalar_lea.hbm %s897_s5, 512 }
 0x251   : > { %p638_p5 = scmp.ne.s32.totalorder %s381_s10, %s637_s29  ;;  %p642_p1 = scmp.lt.s32.totalorder %s381_s10, %s897_s5 }
 0x252   : > { %p643_p4 = scmp.lt.s32.totalorder %s641_s7, %s637_s29 }
 0x253   : > { %p639_p9 = pnand %p638_p5, %p913_p3 }
 0x254   : > { %p644_p6 = por %p643_p4, %p642_p1 }
 0x255   : > { %p640_p11 = pneg %p639_p9 }
 0x257   : > { %p645_p8 = pnand %p644_p6, %p640_p11 }
 0x259   : > { %648 = shalt.err (!%p645_p8)
}
 0x25a   : > { %508 = dma.vmem_to_hbm [thread:$0]  (%p913_p3), %s384_s15, 128, %s381_s10, %s370_s11  }
 0x25b PF: > { %p525_p10 = scmp.ge.s32.totalorder %s691_s21, 2  ;;  %s395_s17 = sand.u32 1, %s679_s18  }
 0x25c   : > { %p914_p7 = scmp.ne.s32.totalorder %s903_s25, 0  ;;  %s396_s23 = scalar_lea.sflag [#allocation4], %s395_s17 }
 0x25e   : > { %p519_p12 = pnand %p525_p10, %p914_p7 }
 0x260   : > { %p520_p2 = pneg %p519_p12 }
 0x262   : > { %674 = dma.done.wait (%p520_p2), %s396_s23, 128  }
 0x263   : > { %676 = vsyncadd (%p520_p2), %s396_s23, 4294967168  ;;  %p19_p13 = scmp.ge.s32.totalorder %s783_s30, 6   ;;  %s915_s18 = smov %s683_s19 }
 0x264   : > { %s916_s19 = smov %s687_s20  ;;  %s917_s20 = smov %s800_s13 }
 0x265   : > { %s918_s21 = smov %s783_s30  ;;  %21 = sbr.rel (!%p19_p13) target bundleno = 6 (0x6), region = 89 }
 0x26a   :  { %401 = vsyncpa [#allocation3], 1 }
 0x26b   :  { %403 = vsyncpa [#allocation3 + $0x1], 1 }
 0x26c   :  { %404 = vsyncpa [#allocation6], 1 }
 0x26d   :  { %405 = vsyncpa [#allocation4], 1 }
 0x26e   :  { %407 = vsyncpa [#allocation4 + $0x1], 1 }

</bundles_post_ra>
